<compile_context>
chip_gen: v5e
topology: v5e:2x2
jax: 0.10.0
libtpu: 0.0.40
codegen_flags: <defaults>
</compile_context>

<pallas_src>
from functools import partial

import jax
import jax.numpy as jnp
import numpy as np
from jax.experimental import pallas as pl
from jax.experimental.pallas import tpu as pltpu


def _conv_gelu_cubic_kernel(w_ref, p_ref, o_ref):
    # w_ref: (OC, Kp)  conv weight flattened (C,KH,KW) + bias column, zero-padded
    # p_ref: (Kp, Mp)  im2col patches (+ ones row for the bias), zero-padded
    # o_ref: (OC, Mp)  fused output
    v1 = jnp.dot(w_ref[...], p_ref[...], preferred_element_type=jnp.float32)
    y3 = v1 * v1 * v1                                   # v1^3
    o_ref[...] = y3 * (jnp.tanh((v1 + 0.044715 * y3) * 0.7978845608028654)
                       + 1.0)


@partial(jax.jit, static_argnames=("stride", "pad"))
def model_forward(x, weight, bias, *, stride=3, pad=1):
    """x: (1, C, H, W) f32; weight: (OC, C, KH, KW); bias: (OC,). Returns NCHW."""
    N, C, H, W = x.shape
    OC, _, KH, KW = weight.shape
    OH = (H + 2 * pad - KH) // stride + 1
    OW = (W + 2 * pad - KW) // stride + 1

    # Fast-path requirements implied by the module (stride == kernel,
    # padded size divides evenly): 25 + 2 = 27 = 9*3.
    assert N == 1
    assert stride == KH == KW
    assert H + 2 * pad == OH * stride and W + 2 * pad == OW * stride

    K = C * KH * KW                   # 27
    M = OH * OW                       # 81
    Kp = 32                           # K + 1 (bias row), rounded to sublane mult
    Mp = 128                          # lane-dense output

    # Collapsed im2col (non-overlapping 3x3 taps because stride == kernel):
    #   (C, 27, 27) -> (C, OH, KH, OW, KW) -> (C, KH, KW, OH, OW) -> (K, M)
    xp = jnp.pad(x[0], ((0, 0), (pad, pad), (pad, pad)))          # (C, 27, 27)
    pt = xp.reshape(C, OH, KH, OW, KW).transpose(0, 2, 4, 1, 3)
    pt = pt.reshape(K, M)                                         # (27, 81)
    # Fold bias into the GEMM via a row of ones; zero-pad K->Kp, M->Mp so the
    # padded lanes/rows compute exactly 0 in the kernel.
    pt = jnp.concatenate([pt, jnp.ones((1, M), jnp.float32)], axis=0)  # (28, 81)
    pt = jnp.pad(pt, ((0, Kp - K - 1), (0, Mp - M)))                   # (32, 128)

    w2d = jnp.concatenate([weight.reshape(OC, K).astype(jnp.float32),
                           bias.reshape(OC, 1).astype(jnp.float32)], axis=1)
    w2d = jnp.pad(w2d, ((0, 0), (0, Kp - K - 1)))                      # (8, 32)

    out = pl.pallas_call(
        _conv_gelu_cubic_kernel,
        in_specs=[
            pl.BlockSpec(memory_space=pltpu.MemorySpace.VMEM),
            pl.BlockSpec(memory_space=pltpu.MemorySpace.VMEM),
        ],
        out_specs=pl.BlockSpec(memory_space=pltpu.MemorySpace.VMEM),
        out_shape=jax.ShapeDtypeStruct((OC, Mp), jnp.float32),
        cost_estimate=pl.CostEstimate(
            flops=2 * OC * Kp * Mp,
            transcendentals=OC * Mp,
            bytes_accessed=(OC * Kp + Kp * Mp + OC * Mp) * 4),
        compiler_params=pltpu.CompilerParams(
            allow_input_fusion=[False, True]),   # fuse im2col into input DMA
    )(w2d, pt)

    # (OC, Mp) -> (OC, M) -> NCHW (N = 1, no transpose needed); fuses under jit.
    return out[:, :M].reshape(N, OC, OH, OW)


def _reference(x, weight, bias, *, stride=3, pad=1):
    v1 = jax.lax.conv_general_dilated(
        x, weight, window_strides=(stride, stride),
        padding=[(pad, pad), (pad, pad)],
        dimension_numbers=("NCHW", "OIHW", "NCHW"),
    ) + bias.reshape(1, -1, 1, 1)
    y3 = v1 * v1 * v1
    return y3 * (jnp.tanh((v1 + 0.044715 * y3) * 0.7978845608028654) + 1.0)


if __name__ == "__main__":
    key = jax.random.PRNGKey(0)
    kx, kw, kb = jax.random.split(key, 3)

    # Input shape implied by the module: (1, 3, 25, 25)
    x = jax.random.normal(kx, (1, 3, 25, 25), dtype=jnp.float32)
    # Conv2d(3, 8, 3) parameters, deterministic synthetic init.
    weight = jax.random.normal(kw, (8, 3, 3, 3), dtype=jnp.float32) * 0.1
    bias = jax.random.normal(kb, (8,), dtype=jnp.float32) * 0.1

    out = model_forward(x, weight, bias)
    jax.block_until_ready(out)

    ref = _reference(x, weight, bias)
    assert out.shape == (1, 8, 9, 9), out.shape
    np.testing.assert_allclose(np.asarray(out), np.asarray(ref),
                               rtol=1e-4, atol=1e-4)

    print("KERNEL_OK")
</pallas_src>

<mosaic_0001>
module attributes {stable_mosaic.version = 11 : i64} {
  func.func @_conv_gelu_cubic_kernel(%arg0: memref<8x32xf32, #tpu.memory_space<vmem>>, %arg1: memref<32x128xf32, #tpu.memory_space<vmem>>, %arg2: memref<8x128xf32, #tpu.memory_space<vmem>>) attributes {dimension_semantics = [], scalar_prefetch = 0 : i64, scratch_operands = 0 : i64, tpu.core_type = #tpu.core_type<tc>} {
    %c0 = arith.constant 0 : index
    %c0_0 = arith.constant 0 : index
    %0 = vector.load %arg0[%c0, %c0_0] : memref<8x32xf32, #tpu.memory_space<vmem>>, vector<8x32xf32>
    %c0_1 = arith.constant 0 : index
    %c0_2 = arith.constant 0 : index
    %1 = vector.load %arg1[%c0_1, %c0_2] : memref<32x128xf32, #tpu.memory_space<vmem>>, vector<32x128xf32>
    %cst = arith.constant dense<0.000000e+00> : vector<8x128xf32>
    %2 = tpu.matmul %0, %1, %cst {dimension_numbers = #tpu.dot_dimension_numbers<[1], [0], [0], [1], [0, 0, 1, 1], [], []>} : vector<8x32xf32>, vector<32x128xf32>, vector<8x128xf32> -> vector<8x128xf32>
    %3 = arith.mulf %2, %2 : vector<8x128xf32>
    %4 = arith.mulf %3, %2 : vector<8x128xf32>
    %cst_3 = arith.constant 4.471500e-02 : f32
    %5 = vector.broadcast %cst_3 : f32 to vector<8x128xf32>
    %6 = arith.mulf %5, %4 : vector<8x128xf32>
    %7 = arith.addf %2, %6 : vector<8x128xf32>
    %cst_4 = arith.constant 0.797884583 : f32
    %8 = vector.broadcast %cst_4 : f32 to vector<8x128xf32>
    %9 = arith.mulf %7, %8 : vector<8x128xf32>
    %10 = math.tanh %9 : vector<8x128xf32>
    %cst_5 = arith.constant 1.000000e+00 : f32
    %11 = vector.broadcast %cst_5 : f32 to vector<8x128xf32>
    %12 = arith.addf %10, %11 : vector<8x128xf32>
    %13 = arith.mulf %4, %12 : vector<8x128xf32>
    %c0_6 = arith.constant 0 : index
    %c0_7 = arith.constant 0 : index
    %14 = vector.load %arg2[%c0_6, %c0_7] : memref<8x128xf32, #tpu.memory_space<vmem>>, vector<8x128xf32>
    tpu.vector_store %arg2[%c0_6, %c0_7], %13 {strides = array<i32>} : memref<8x128xf32, #tpu.memory_space<vmem>>, vector<8x128xf32>,
    return
  }
}

</mosaic_0001>

<bundles_post_ra>
// kernel: model_forward.2
= control target key start
LH: loop header
LB: loop body
LE: loop exit
PB: predicated region body
PF: predicated region fallthrough
CT: control target
= control target key end

     0   :  { %v25_v4 = vlaneseq  ;;  %vm198_vm11 = vcmask 261120   ;;  %s330_s0 = inlined_call_operand.vmem [shape: f32[8,32], index: 0, kind: input, shape index: {}]   ;;  %s331_s1 = inlined_call_operand.vmem [shape: f32[27,81], index: 1, kind: input, shape index: {}]   ;;  %s332_s2 = inlined_call_operand.<no memory space> [shape: f32[], index: 2, kind: input, shape index: {}]   ;;  %s333_s3 = inlined_call_operand.<no memory space> [shape: s32[], index: 3, kind: input, shape index: {}]   ;;  %s334_s4 = inlined_call_operand.<no memory space> [shape: f32[], index: 4, kind: input, shape index: {}]   ;;  %s335_s5 = inlined_call_operand.<no memory space> [shape: s32[], index: 5, kind: input, shape index: {}]   ;;  %s336_s6 = inlined_call_operand.vmem [shape: f32[8,128], index: 6, kind: output, shape index: {}]  }
   0x1   :  { %v11_v0 = vstv %s332_s2  ;;  %v12_v1 = vstv %s333_s3  ;;  %v13_v2 = vstv %s334_s4  ;;  %v14_v3 = vstv %s335_s5 }
   0x2   :  { %v26_v5 = vand.u32 127, %v25_v4  ;;  %v31_v6 = vshrl.u32 %v25_v4, 7  ;;  %v240_v7 = vld [vmem:[%s331_s1 + $0x10] sm:$0xff]  ;;  %v237_v8 = vld [vmem:[%s331_s1 + $0x8] sm:$0xff]  ;;  %v243_v10 = vld [vmem:[%s331_s1 + $0x18] sm:$0xff] }
   0x3   :  { %v19_v15 = vld [vmem:[%s331_s1] sm:$0xff] }
   0x4   :  { %vm28_vm0 = vcmp.lt.s32.totalorder %v26_v5, 81  ;;  %vm302_vm1 = vcmp.lt.s32.totalorder %v26_v5, %v12_v1  ;;  %v153_v11 = vadd.s32 24, %v31_v6  ;;  %v120_v12 = vadd.s32 16, %v31_v6  ;;  %v193_v28 = vld [vmem:[%s330_s0] sm:$0xff] }
   0x5   :  { %v116_v13 = vsel %vm28_vm0, %v240_v7, %v11_v0  ;;  %v76_v14 = vadd.s32 8, %v31_v6  ;;  %v72_v16 = vsel %vm28_vm0, %v237_v8, %v11_v0  ;;  %v29_v20 = vsel %vm28_vm0, %v19_v15, %v11_v0 }
   0x6   :  { %vm154_vm2 = vcmp.lt.s32.totalorder %v153_v11, 27  ;;  %vm167_vm3 = vcmp.lt.s32.totalorder %v153_v11, %v14_v3  ;;  %vm123_vm4 = vcmp.lt.s32.totalorder %v120_v12, %v14_v3  ;;  %vm36_vm8 = vcmp.lt.s32.totalorder %v31_v6, %v14_v3 }
   0x7   :  { %v155_v17 = vsel %vm154_vm2, %v243_v10, %v11_v0  ;;  %vm244_vm5 = vmand %vm167_vm3, %vm302_vm1  ;;  %v138_v18 = vsel %vm123_vm4, %v116_v13, %v13_v2  ;;  %vm79_vm6 = vcmp.lt.s32.totalorder %v76_v14, %v14_v3  ;;  %v51_v25 = vsel %vm36_vm8, %v29_v20, %v13_v2 }
   0x8   :  { %v160_v19 = vsel %vm28_vm0, %v155_v17, %v11_v0  ;;  %vm241_vm7 = vmand %vm123_vm4, %vm302_vm1  ;;  %v94_v22 = vsel %vm79_vm6, %v72_v16, %v13_v2 }
   0x9   :  { %v182_v21 = vsel %vm167_vm3, %v160_v19, %v13_v2  ;;  %vm238_vm9 = vmand %vm79_vm6, %vm302_vm1  ;;  %v143_v24 = vsel %vm241_vm7, %v138_v18, %v13_v2 }
   0xa   :  { %v187_v23 = vsel %vm244_vm5, %v182_v21, %v13_v2  ;;  %vm235_vm10 = vmand %vm36_vm8, %vm302_vm1  ;;  %v99_v26 = vsel %vm238_vm9, %v94_v22, %v13_v2 }
   0xb   :  { %214 = vmatpush.msra.mxu0 %v187_v23  ;;  %v56_v27 = vsel %vm235_vm10, %v51_v25, %v13_v2 }
   0xd   :  { %215 = vmatpush.msra.mxu0 %v143_v24 }
   0xf   :  { %216 = vmatpush.msra.mxu0 %v99_v26 }
  0x11   :  { %217 = vmatpush.msra.mxu0 %v56_v27 }
  0x12   :  { %246 = vmatmul.msk.f32.vlgmr.msra.gmra.mxu0 %vm198_vm11, %v193_v28 }
  0x8f   :  { %v219_v29 = vpop.f32.mrf.mxu0 }
  0x90   :  { %v222_v30 = vmul.f32 %v219_v29, %v219_v29 }
  0x92   :  { %v223_v31 = vmul.f32 %v222_v30, %v219_v29 }
  0x94   :  { %v224_v32 = vmul.f32 0.044715, %v223_v31 }
  0x96   :  { %v225_v33 = vadd.f32 %v224_v32, %v219_v29 }
  0x98   :  { %v226_v34 = vmul.f32 0.7978846, %v225_v33 }
  0x9a   :  { %247 = vtanh.f32 %v226_v34 }
  0xa0   :  { %v248_v35 = vpop.eup %247 }
  0xa1   :  { %v228_v36 = vadd.f32 1.0, %v248_v35 }
  0xa3   :  { %v229_v37 = vmul.f32 %v228_v36, %v223_v31 }
  0xa5   :  { %230 = vst [vmem:[%s336_s6] sm:$0xff] %v229_v37 }

</bundles_post_ra>
